<compile_context>
chip_gen: v7x
topology: tpu7x:2x2x1
jax: 0.10.0
libtpu: 0.0.40
codegen_flags: <defaults>
</compile_context>

<pallas_src>
import jax
import jax.numpy as jnp
from jax import lax
from jax.experimental import pallas as pl
from jax.experimental.pallas import tpu as pltpu


def _round_up(v, m):
    return (v + m - 1) // m * m


def _make_kernel(l_valid, nb):
    """Kernel body; true (unpadded) length and per-step batch Nb baked in."""

    def kernel(x_ref, w1_ref, sh1_ref, w2_ref, sh2_ref, o_ref):
        cp = x_ref.shape[1]
        wl = x_ref.shape[2]

        # Resident weights / shifts (constant index maps): load once per step.
        w1m, w1c, w1p = w1_ref[0], w1_ref[1], w1_ref[2]   # (Cp, Cp) bf16 taps
        w2m, w2c, w2p = w2_ref[0], w2_ref[1], w2_ref[2]
        sh1 = sh1_ref[...]                                # (Cp, 1) f32
        sh2 = sh2_ref[...]

        zcol = jnp.zeros((cp, 1), x_ref.dtype)
        if l_valid < wl:                                  # static condition
            col = lax.broadcasted_iota(jnp.int32, (1, wl), 1)
            valid = col < l_valid
        else:
            valid = None

        def conv3_bn(v, w_m, w_c, w_p, sh):
            # out[:, l] = W_m @ v[:, l-1] + W_c @ v[:, l] + W_p @ v[:, l+1] + sh
            # Three accumulating MXU matmuls; no (3Cp, Wp) concat materialized.
            prev = jnp.concatenate([zcol, v[:, :-1]], axis=1)
            nxt = jnp.concatenate([v[:, 1:], zcol], axis=1)
            y = jnp.dot(w_c, v, preferred_element_type=jnp.float32)
            y = y + jnp.dot(w_m, prev, preferred_element_type=jnp.float32)
            y = y + jnp.dot(w_p, nxt, preferred_element_type=jnp.float32)
            return y + sh

        def process(b):
            x = x_ref[b]                                  # (Cp, Wp) bf16
            # conv1 -> bn1 -> relu; zero padded tail so it can't leak into conv2
            h = jnp.maximum(conv3_bn(x, w1m, w1c, w1p, sh1), 0.0)
            if valid is not None:
                h = jnp.where(valid, h, 0.0)
            h = h.astype(x.dtype)
            # conv2 -> bn2 -> +identity -> relu
            y = conv3_bn(h, w2m, w2c, w2p, sh2) + x.astype(jnp.float32)
            o_ref[b] = jnp.maximum(y, 0.0).astype(o_ref.dtype)

        if nb == 1:
            process(0)
        else:
            def body(b, carry):
                process(b)
                return carry
            lax.fori_loop(0, nb, body, 0)

    return kernel


def basic_block_forward(x_ncl, w1, b1, bn1, w2, b2, bn2, eps=1e-5,
                        compute_dtype=jnp.bfloat16, out_dtype=None,
                        keep_padded=False):
    """x_ncl: (N, C, L) like PyTorch; w: (O, I, 3) like PyTorch Conv1d (k=3, pad=1).

    Identity-shortcut BasicBlock (stride=1, inplanes == planes), eval-mode BN.
    Output dtype defaults to bf16 (halves HBM writeback); pass
    out_dtype=jnp.float32 for f32 output.
    """
    if out_dtype is None:
        out_dtype = compute_dtype
    N, C, L = x_ncl.shape
    assert w1.shape == (C, C, 3) and w2.shape == (C, C, 3), \
        "identity-shortcut BasicBlock requires inplanes == planes"

    Cp = _round_up(C, 16)      # sublane / contraction dim (bf16 pack = 16)
    Wp = _round_up(L, 128)     # lane dim -> lane-dense stores

    def fold(wk, bk, bnp):
        g, beta, mean, var = bnp
        s = g / jnp.sqrt(var + eps)                                    # (C,)
        taps = jnp.stack(
            [jnp.pad(wk[:, :, k] * s[:, None], ((0, Cp - C), (0, Cp - C)))
             for k in range(3)], axis=0)                               # (3,Cp,Cp)
        shift = jnp.pad((bk - mean) * s + beta, (0, Cp - C))[:, None]  # (Cp, 1)
        return taps.astype(compute_dtype), shift.astype(jnp.float32)

    w1t, sh1 = fold(w1, b1, bn1)
    w2t, sh2 = fold(w2, b2, bn2)

    # TODO(synk): in a chained multi-block network keep activations in the
    # padded (N, Cp, Wp) bf16 layout across blocks (keep_padded=True and feed
    # the padded output straight back in) so these XLA pad/slice HBM passes
    # disappear entirely.
    if (C, L) == (Cp, Wp):
        x_p = x_ncl.astype(compute_dtype)
    else:
        x_p = jnp.pad(x_ncl, ((0, 0), (0, Cp - C), (0, Wp - L))).astype(compute_dtype)

    # ---- generation-aware VMEM budgeting & per-step batch (Nb) selection ----
    try:
        vmem_cap = int(pltpu.get_tpu_info().vmem_capacity_bytes)
    except Exception:                      # fallback: assume smallest (v7x) part
        vmem_cap = 64 << 20
    itm_in = jnp.dtype(compute_dtype).itemsize
    itm_out = jnp.dtype(out_dtype).itemsize

    def vmem_estimate(nb, in_bufs=2):
        blk_in = nb * Cp * Wp * itm_in
        blk_out = nb * Cp * Wp * itm_out
        weights = 2 * (3 * Cp * Cp * itm_in + Cp * 4)
        # live in-kernel intermediates per batch item: prev/nxt/h (bf16) plus
        # two f32 (Cp, Wp) accumulators (conv out / residual sum).
        scratch = Cp * Wp * (3 * itm_in + 2 * 4)
        return in_bufs * blk_in + 2 * blk_out + 2 * weights + scratch + (2 << 20)

    # keep grid >= 2 (feeds both TensorCores on v7x), fit in ~1/2 of VMEM, and
    # only use an Nb that divides N (no batch padding needed).
    nb_cap = max(1, N // 2) if N >= 2 else 1
    nb = 1
    for cand in range(min(8, nb_cap), 0, -1):
        if N % cand == 0 and vmem_estimate(cand) <= vmem_cap // 2:
            nb = cand
            break
    grid_len = N // nb

    # Deeper input pipelining only on 128-MiB parts (v5e/v6e) with a grid long
    # enough for it to matter; v7x (64 MiB) stays double-buffered.
    in_bufs = 3 if (vmem_cap >= (100 << 20) and grid_len >= 4) else 2
    if in_bufs == 3:
        x_spec = pl.BlockSpec((nb, Cp, Wp), lambda n: (n, 0, 0),
                              pipeline_mode=pl.Buffered(3))
    else:
        x_spec = pl.BlockSpec((nb, Cp, Wp), lambda n: (n, 0, 0))

    vmem_limit = int(min(int(vmem_cap * 0.85),
                         max(2 * vmem_estimate(nb, in_bufs), 32 << 20)))

    out_p = pl.pallas_call(
        _make_kernel(L, nb),
        out_shape=jax.ShapeDtypeStruct((N, Cp, Wp), out_dtype),
        grid=(grid_len,),
        in_specs=[
            x_spec,                                            # x (Nb items/step)
            pl.BlockSpec((3, Cp, Cp), lambda n: (0, 0, 0)),    # w1 taps (resident)
            pl.BlockSpec((Cp, 1), lambda n: (0, 0)),           # shift1
            pl.BlockSpec((3, Cp, Cp), lambda n: (0, 0, 0)),    # w2 taps (resident)
            pl.BlockSpec((Cp, 1), lambda n: (0, 0)),           # shift2
        ],
        out_specs=pl.BlockSpec((nb, Cp, Wp), lambda n: (n, 0, 0)),
        compiler_params=pltpu.CompilerParams(
            dimension_semantics=("parallel",),
            vmem_limit_bytes=vmem_limit),
    )(x_p, w1t, sh1, w2t, sh2)

    if keep_padded:
        return out_p
    return out_p[:, :C, :L]


def reference(x, w1, b1, bn1, w2, b2, bn2, eps=1e-5):
    """Plain-JAX f32 reference of the same forward pass (NCL layout)."""
    def conv(x, w, b):
        y = lax.conv_general_dilated(
            x, w, window_strides=(1,), padding=((1, 1),),
            dimension_numbers=("NCH", "OIH", "NCH"))
        return y + b[None, :, None]

    def bn(x, p):
        g, be, m, v = p
        return ((x - m[None, :, None]) / jnp.sqrt(v[None, :, None] + eps)
                * g[None, :, None] + be[None, :, None])

    out = jax.nn.relu(bn(conv(x, w1, b1), bn1))
    out = bn(conv(out, w2, b2), bn2)
    return jax.nn.relu(out + x)


if __name__ == "__main__":
    # Small shapes: batch=2, inplanes=planes=8, seq length L=16.
    N, C, L = 2, 8, 16
    key = jax.random.PRNGKey(0)
    ks = jax.random.split(key, 12)

    x = jax.random.normal(ks[0], (N, C, L), jnp.float32)

    w1 = 0.2 * jax.random.normal(ks[1], (C, C, 3), jnp.float32)
    b1 = 0.1 * jax.random.normal(ks[2], (C,), jnp.float32)
    w2 = 0.2 * jax.random.normal(ks[3], (C, C, 3), jnp.float32)
    b2 = 0.1 * jax.random.normal(ks[4], (C,), jnp.float32)

    bn1 = (1.0 + 0.1 * jax.random.normal(ks[5], (C,), jnp.float32),     # gamma
           0.1 * jax.random.normal(ks[6], (C,), jnp.float32),           # beta
           0.1 * jax.random.normal(ks[7], (C,), jnp.float32),           # run mean
           0.5 + jnp.abs(jax.random.normal(ks[8], (C,), jnp.float32)))  # run var
    bn2 = (1.0 + 0.1 * jax.random.normal(ks[9], (C,), jnp.float32),
           0.1 * jax.random.normal(ks[10], (C,), jnp.float32),
           0.1 * jax.random.normal(ks[11], (C,), jnp.float32),
           0.5 + jnp.abs(jax.random.normal(ks[0], (C,), jnp.float32)))

    out = jax.block_until_ready(
        basic_block_forward(x, w1, b1, bn1, w2, b2, bn2))
    ref = reference(x, w1, b1, bn1, w2, b2, bn2)

    # bf16 MXU operands + bf16 output with f32 accumulation -> bf16 tolerance.
    if not jnp.allclose(out.astype(jnp.float32), ref, atol=1e-1, rtol=1e-1):
        raise AssertionError("Pallas kernel mismatch vs reference")
    print("KERNEL_OK")
</pallas_src>

<mosaic_0001>
module attributes {stable_mosaic.version = 11 : i64} {
  func.func @kernel(%arg0: i32, %arg1: memref<1x16x128xbf16, #tpu.memory_space<vmem>>, %arg2: memref<3x16x16xbf16, #tpu.memory_space<vmem>>, %arg3: memref<16x1xf32, #tpu.memory_space<vmem>>, %arg4: memref<3x16x16xbf16, #tpu.memory_space<vmem>>, %arg5: memref<16x1xf32, #tpu.memory_space<vmem>>, %arg6: memref<1x16x128xbf16, #tpu.memory_space<vmem>>) attributes {dimension_semantics = [#tpu.dimension_semantics<parallel>], iteration_bounds = array<i64: 2>, scalar_prefetch = 0 : i64, scratch_operands = 0 : i64, tpu.core_type = #tpu.core_type<tc>, window_params = [{transform_indices = @transform_0, window_bounds = array<i64: 1, 16, 128>}, {pipeline_mode = #tpu.pipeline_mode<synchronous>, transform_indices = @transform_1, window_bounds = array<i64: 3, 16, 16>}, {pipeline_mode = #tpu.pipeline_mode<synchronous>, transform_indices = @transform_2, window_bounds = array<i64: 16, 1>}, {pipeline_mode = #tpu.pipeline_mode<synchronous>, transform_indices = @transform_3, window_bounds = array<i64: 3, 16, 16>}, {pipeline_mode = #tpu.pipeline_mode<synchronous>, transform_indices = @transform_4, window_bounds = array<i64: 16, 1>}, {transform_indices = @transform_5, window_bounds = array<i64: 1, 16, 128>}]} {
    %c0 = arith.constant 0 : index
    %c0_0 = arith.constant 0 : index
    %c0_1 = arith.constant 0 : index
    %0 = vector.load %arg2[%c0, %c0_0, %c0_1] : memref<3x16x16xbf16, #tpu.memory_space<vmem>>, vector<1x16x16xbf16>
    %1 = vector.shape_cast %0 : vector<1x16x16xbf16> to vector<16x16xbf16>
    %c1 = arith.constant 1 : index
    %c0_2 = arith.constant 0 : index
    %c0_3 = arith.constant 0 : index
    %2 = vector.load %arg2[%c1, %c0_2, %c0_3] : memref<3x16x16xbf16, #tpu.memory_space<vmem>>, vector<1x16x16xbf16>
    %3 = vector.shape_cast %2 : vector<1x16x16xbf16> to vector<16x16xbf16>
    %c2 = arith.constant 2 : index
    %c0_4 = arith.constant 0 : index
    %c0_5 = arith.constant 0 : index
    %4 = vector.load %arg2[%c2, %c0_4, %c0_5] : memref<3x16x16xbf16, #tpu.memory_space<vmem>>, vector<1x16x16xbf16>
    %5 = vector.shape_cast %4 : vector<1x16x16xbf16> to vector<16x16xbf16>
    %c0_6 = arith.constant 0 : index
    %c0_7 = arith.constant 0 : index
    %c0_8 = arith.constant 0 : index
    %6 = vector.load %arg4[%c0_6, %c0_7, %c0_8] : memref<3x16x16xbf16, #tpu.memory_space<vmem>>, vector<1x16x16xbf16>
    %7 = vector.shape_cast %6 : vector<1x16x16xbf16> to vector<16x16xbf16>
    %c1_9 = arith.constant 1 : index
    %c0_10 = arith.constant 0 : index
    %c0_11 = arith.constant 0 : index
    %8 = vector.load %arg4[%c1_9, %c0_10, %c0_11] : memref<3x16x16xbf16, #tpu.memory_space<vmem>>, vector<1x16x16xbf16>
    %9 = vector.shape_cast %8 : vector<1x16x16xbf16> to vector<16x16xbf16>
    %c2_12 = arith.constant 2 : index
    %c0_13 = arith.constant 0 : index
    %c0_14 = arith.constant 0 : index
    %10 = vector.load %arg4[%c2_12, %c0_13, %c0_14] : memref<3x16x16xbf16, #tpu.memory_space<vmem>>, vector<1x16x16xbf16>
    %11 = vector.shape_cast %10 : vector<1x16x16xbf16> to vector<16x16xbf16>
    %c0_15 = arith.constant 0 : index
    %c0_16 = arith.constant 0 : index
    %12 = vector.load %arg3[%c0_15, %c0_16] : memref<16x1xf32, #tpu.memory_space<vmem>>, vector<16x1xf32>
    %c0_17 = arith.constant 0 : index
    %c0_18 = arith.constant 0 : index
    %13 = vector.load %arg5[%c0_17, %c0_18] : memref<16x1xf32, #tpu.memory_space<vmem>>, vector<16x1xf32>
    %cst = arith.constant 0.000000e+00 : bf16
    %14 = vector.broadcast %cst : bf16 to vector<16x1xbf16>
    %15 = tpu.iota {dimensions = array<i32: 1>} : vector<1x128xi32>
    %c16_i32 = arith.constant 16 : i32
    %16 = vector.broadcast %c16_i32 : i32 to vector<1x128xi32>
    %17 = arith.cmpi slt, %15, %16 : vector<1x128xi32>
    %c0_19 = arith.constant 0 : index
    %c0_20 = arith.constant 0 : index
    %c0_21 = arith.constant 0 : index
    %18 = vector.load %arg1[%c0_19, %c0_20, %c0_21] : memref<1x16x128xbf16, #tpu.memory_space<vmem>>, vector<1x16x128xbf16>
    %19 = vector.shape_cast %18 : vector<1x16x128xbf16> to vector<16x128xbf16>
    %20 = vector.extract_strided_slice %19 {offsets = [0, 0], sizes = [16, 127], strides = [1, 1]} : vector<16x128xbf16> to vector<16x127xbf16>
    %21 = tpu.concatenate %14, %20 in 1 : vector<16x1xbf16>, vector<16x127xbf16> -> vector<16x128xbf16>
    %22 = vector.extract_strided_slice %19 {offsets = [0, 1], sizes = [16, 127], strides = [1, 1]} : vector<16x128xbf16> to vector<16x127xbf16>
    %23 = tpu.concatenate %22, %14 in 1 : vector<16x127xbf16>, vector<16x1xbf16> -> vector<16x128xbf16>
    %cst_22 = arith.constant dense<0.000000e+00> : vector<16x128xf32>
    %24 = tpu.matmul %3, %19, %cst_22 {dimension_numbers = #tpu.dot_dimension_numbers<[1], [0], [0], [1], [0, 0, 1, 1], [], []>} : vector<16x16xbf16>, vector<16x128xbf16>, vector<16x128xf32> -> vector<16x128xf32>
    %cst_23 = arith.constant dense<0.000000e+00> : vector<16x128xf32>
    %25 = tpu.matmul %1, %21, %cst_23 {dimension_numbers = #tpu.dot_dimension_numbers<[1], [0], [0], [1], [0, 0, 1, 1], [], []>} : vector<16x16xbf16>, vector<16x128xbf16>, vector<16x128xf32> -> vector<16x128xf32>
    %26 = arith.addf %24, %25 : vector<16x128xf32>
    %cst_24 = arith.constant dense<0.000000e+00> : vector<16x128xf32>
    %27 = tpu.matmul %5, %23, %cst_24 {dimension_numbers = #tpu.dot_dimension_numbers<[1], [0], [0], [1], [0, 0, 1, 1], [], []>} : vector<16x16xbf16>, vector<16x128xbf16>, vector<16x128xf32> -> vector<16x128xf32>
    %28 = arith.addf %26, %27 : vector<16x128xf32>
    %29 = vector.broadcast %12 : vector<16x1xf32> to vector<16x128xf32>
    %30 = arith.addf %28, %29 : vector<16x128xf32>
    %cst_25 = arith.constant 0.000000e+00 : f32
    %31 = vector.broadcast %cst_25 : f32 to vector<16x128xf32>
    %32 = arith.maximumf %30, %31 : vector<16x128xf32>
    %cst_26 = arith.constant 0.000000e+00 : f32
    %33 = vector.shape_cast %17 : vector<1x128xi1> to vector<1x128xi1>
    %34 = vector.broadcast %33 : vector<1x128xi1> to vector<16x128xi1>
    %35 = vector.broadcast %cst_26 : f32 to vector<16x128xf32>
    %36 = arith.select %34, %32, %35 : vector<16x128xi1>, vector<16x128xf32>
    %37 = arith.truncf %36 : vector<16x128xf32> to vector<16x128xbf16>
    %38 = vector.extract_strided_slice %37 {offsets = [0, 0], sizes = [16, 127], strides = [1, 1]} : vector<16x128xbf16> to vector<16x127xbf16>
    %39 = tpu.concatenate %14, %38 in 1 : vector<16x1xbf16>, vector<16x127xbf16> -> vector<16x128xbf16>
    %40 = vector.extract_strided_slice %37 {offsets = [0, 1], sizes = [16, 127], strides = [1, 1]} : vector<16x128xbf16> to vector<16x127xbf16>
    %41 = tpu.concatenate %40, %14 in 1 : vector<16x127xbf16>, vector<16x1xbf16> -> vector<16x128xbf16>
    %cst_27 = arith.constant dense<0.000000e+00> : vector<16x128xf32>
    %42 = tpu.matmul %9, %37, %cst_27 {dimension_numbers = #tpu.dot_dimension_numbers<[1], [0], [0], [1], [0, 0, 1, 1], [], []>} : vector<16x16xbf16>, vector<16x128xbf16>, vector<16x128xf32> -> vector<16x128xf32>
    %cst_28 = arith.constant dense<0.000000e+00> : vector<16x128xf32>
    %43 = tpu.matmul %7, %39, %cst_28 {dimension_numbers = #tpu.dot_dimension_numbers<[1], [0], [0], [1], [0, 0, 1, 1], [], []>} : vector<16x16xbf16>, vector<16x128xbf16>, vector<16x128xf32> -> vector<16x128xf32>
    %44 = arith.addf %42, %43 : vector<16x128xf32>
    %cst_29 = arith.constant dense<0.000000e+00> : vector<16x128xf32>
    %45 = tpu.matmul %11, %41, %cst_29 {dimension_numbers = #tpu.dot_dimension_numbers<[1], [0], [0], [1], [0, 0, 1, 1], [], []>} : vector<16x16xbf16>, vector<16x128xbf16>, vector<16x128xf32> -> vector<16x128xf32>
    %46 = arith.addf %44, %45 : vector<16x128xf32>
    %47 = vector.broadcast %13 : vector<16x1xf32> to vector<16x128xf32>
    %48 = arith.addf %46, %47 : vector<16x128xf32>
    %49 = arith.extf %19 : vector<16x128xbf16> to vector<16x128xf32>
    %50 = arith.addf %48, %49 : vector<16x128xf32>
    %cst_30 = arith.constant 0.000000e+00 : f32
    %51 = vector.broadcast %cst_30 : f32 to vector<16x128xf32>
    %52 = arith.maximumf %50, %51 : vector<16x128xf32>
    %53 = arith.truncf %52 : vector<16x128xf32> to vector<16x128xbf16>
    %c0_31 = arith.constant 0 : index
    %c0_32 = arith.constant 0 : index
    %c0_33 = arith.constant 0 : index
    %54 = vector.load %arg6[%c0_31, %c0_32, %c0_33] : memref<1x16x128xbf16, #tpu.memory_space<vmem>>, vector<1x16x128xbf16>
    %55 = vector.shape_cast %54 : vector<1x16x128xbf16> to vector<16x128xbf16>
    %56 = vector.shape_cast %53 : vector<16x128xbf16> to vector<1x16x128xbf16>
    tpu.vector_store %arg6[%c0_31, %c0_32, %c0_33], %56 {strides = array<i32>} : memref<1x16x128xbf16, #tpu.memory_space<vmem>>, vector<1x16x128xbf16>,
    return
  }
  func.func @transform_0(%arg0: i32) -> (i32, i32, i32) {
    %c0_i32 = arith.constant 0 : i32
    %c0_i32_0 = arith.constant 0 : i32
    %c0_i32_1 = arith.constant 0 : i32
    return %arg0, %c0_i32, %c0_i32_0 : i32, i32, i32
  }
  func.func @transform_1(%arg0: i32) -> (i32, i32, i32) {
    %c0_i32 = arith.constant 0 : i32
    %c0_i32_0 = arith.constant 0 : i32
    %c0_i32_1 = arith.constant 0 : i32
    %c0_i32_2 = arith.constant 0 : i32
    return %c0_i32, %c0_i32_0, %c0_i32_1 : i32, i32, i32
  }
  func.func @transform_2(%arg0: i32) -> (i32, i32) {
    %c0_i32 = arith.constant 0 : i32
    %c0_i32_0 = arith.constant 0 : i32
    %c0_i32_1 = arith.constant 0 : i32
    return %c0_i32, %c0_i32_0 : i32, i32
  }
  func.func @transform_3(%arg0: i32) -> (i32, i32, i32) {
    %c0_i32 = arith.constant 0 : i32
    %c0_i32_0 = arith.constant 0 : i32
    %c0_i32_1 = arith.constant 0 : i32
    %c0_i32_2 = arith.constant 0 : i32
    return %c0_i32, %c0_i32_0, %c0_i32_1 : i32, i32, i32
  }
  func.func @transform_4(%arg0: i32) -> (i32, i32) {
    %c0_i32 = arith.constant 0 : i32
    %c0_i32_0 = arith.constant 0 : i32
    %c0_i32_1 = arith.constant 0 : i32
    return %c0_i32, %c0_i32_0 : i32, i32
  }
  func.func @transform_5(%arg0: i32) -> (i32, i32, i32) {
    %c0_i32 = arith.constant 0 : i32
    %c0_i32_0 = arith.constant 0 : i32
    %c0_i32_1 = arith.constant 0 : i32
    return %arg0, %c0_i32, %c0_i32_0 : i32, i32, i32
  }
}

</mosaic_0001>

<bundles_post_ra>
// kernel: tpu_custom_call.1
= control target key start
LH: loop header
LB: loop body
LE: loop exit
PB: predicated region body
PF: predicated region fallthrough
CT: control target
= control target key end

     0   :  { %10 = vsyncpa [#allocation3], 0  ;;  %s1381_s0 = inlined_call_operand.hbm [shape: bf16[2,16,128], index: 0, kind: input, shape index: {}]   ;;  %s1382_s1 = inlined_call_operand.vmem [shape: bf16[3,16,16], index: 1, kind: input, shape index: {}]   ;;  %s1383_s2 = inlined_call_operand.vmem [shape: f32[16,1], index: 2, kind: input, shape index: {}]   ;;  %s1384_s3 = inlined_call_operand.hbm [shape: bf16[3,16,16], index: 3, kind: input, shape index: {}]   ;;  %s1385_s4 = inlined_call_operand.vmem [shape: f32[16,1], index: 4, kind: input, shape index: {}]   ;;  %s1386_s5 = inlined_call_operand.hbm [shape: bf16[2,16,128], index: 5, kind: output, shape index: {}]  }
   0x1   :  { %12 = vsyncpa [#allocation3 + $0x1], 0 }
   0x2   :  { %13 = vsyncpa [#allocation6], 0 }
   0x3   :  { %14 = vsyncpa [#allocation4], 0 }
   0x4   :  { %16 = vsyncpa [#allocation4 + $0x1], 0  ;;  %s1104_s18 = smov 0   ;;  %s1106_s19 = smov 0  }
   0x5   :  { %s1108_s20 = smov 0   ;;  %s1110_s21 = smov 0  }
   0x6 LB: > { %s1125_s22 = sadd.s32 4294967295, %s1060_s21   ;;  %s757_s23 = sadd.s32 4294967294, %s1060_s21   ;;  %s1060_s21 = sphi %s1110_s21, %s1408_s21   ;;  %s1056_s20 = sphi %s1108_s20, %s1407_s20   ;;  %s1052_s19 = sphi %s1106_s19, %s1406_s19   ;;  %s1048_s18 = sphi %s1104_s18, %s1405_s18  }
   0x7   : > { %p42_p0 = scmp.ne.s32.totalorder %s1052_s19, %s1048_s18  ;;  %p1387_p1 = scmp.eq.s32.totalorder %s1125_s22, 0 }
   0x8   : > { %p156_p3 = scmp.eq.s32.totalorder %s757_s23, 1  ;;  %p758_p5 = scmp.ge.s32.totalorder %s1060_s21, 1 }
   0x9   : > { %p1134_p4 = por %p1387_p1, %p42_p0  ;;  %p163_p7 = scmp.lt.s32.totalorder %s1060_s21, 3 }
   0xa   : > { %p1139_p6 = por %p156_p3, %p42_p0  ;;  %s1062_s27 = smov [#allocation5]  }
   0xb   : > { %s1390_s24 = scalar_select %p1134_p4, 1, 0 }
   0xc   : > { %s1391_s25 = scalar_select %p1139_p6, 1, 0 }
   0xd   : > { %p1144_p8 = pnand %p758_p5, %p163_p7  ;;  %s181_s28 = sshll.u32 %s1062_s27, 4  ;;  %s1148_s28 = int_to_ptr.vmem [resolvable:$true] %s181_s28 }
   0xe   : > { %s1160_s30 = sadd.s32 1, %s1060_s21   ;;  %s29_s6 = sadd.s32 1, %s1056_s20 }
   0xf   : > { %s1392_s26 = scalar_select %p1144_p8, 1, 0 }
  0x10   : > { %p864_p9 = pneg %p1144_p8  ;;  %s26_s7 = ssub.s32 %s1060_s21, %s1160_s30 }
  0x11   : > { %s932_s10 = scalar_lea.hbm %s1384_s3, 384 }
  0x12   : > { %p1155_p11 = pnand %p864_p9, %p1387_p1  ;;  %p933_p12 = scmp.ne.s32.totalorder %s1384_s3, %s932_s10 }
  0x13   : > { %p939_p5 = scmp.lt.u32.totalorder %s932_s10, %s1384_s3 }
  0x14   : > { %p934_p13 = pneg %p1155_p11 }
  0x16   : > { %p935_p0 = pnand %p934_p13, %p933_p12 }
  0x18   : > { %p936_p3 = pneg %p935_p0 }
  0x1a   : > { %p941_p7 = pnand %p939_p5, %p936_p3 }
  0x1c   : > { %944 = shalt.err (!%p941_p7)
}
  0x1d   : > { %s945_s15 = scalar_lea.vmem %s1148_s28, 384  ;;  %p953_p2 = scmp.lt.s32.totalorder %s1148_s28, %s1148_s28 }
  0x1e   : > { %p946_p9 = scmp.ne.s32.totalorder %s1148_s28, %s945_s15  ;;  %p954_p6 = scmp.lt.s32.totalorder %s945_s15, %s945_s15 }
  0x20   : > { %p948_p10 = pnand %p946_p9, %p934_p13  ;;  %p955_p4 = por %p954_p6, %p953_p2 }
  0x22   : > { %p949_p1 = pneg %p948_p10 }
  0x24   : > { %p956_p8 = pnand %p955_p4, %p949_p1 }
  0x26   : > { %959 = shalt.err (!%p956_p8)
}
  0x27   : > { %s1063_s16 = smov 64   ;;  %s1064_s17 = smov 4  }
  0x28   : > { %867 = dma.hbm_to_vmem [thread:$0]  (!%p1155_p11), %s1384_s3, 384, %s1148_s28, [#allocation6], %s1063_s16, %s1063_s16, %s1064_s17  }
  0x29   : > { %p27_p1 = scmp.eq.s32.totalorder %s26_s7, 0  ;;  %p36_p2 = scmp.ne.s32.totalorder %s1056_s20, %s1052_s19 }
  0x2a   : > { %p37_p4 = scmp.eq.s32.totalorder %s1060_s21, 0  ;;  %p877_p6 = scmp.lt.s32.totalorder %s1060_s21, 2 }
  0x2b   : > { %s1194_s8 = scalar_select %p27_p1, %s1056_s20, %s29_s6  }
  0x2c   : > { %p38_p8 = por %p37_p4, %p36_p2  ;;  %p1394_p10 = scmp.eq.s32.totalorder %s1125_s22, 1 }
  0x2d   : > { %s198_s29 = sand.u32 1, %s1056_s20   ;;  %s799_s10 = sshll.u32 %s1060_s21, 7 }
  0x2e   : > { %p1198_p12 = por %p1394_p10, %p36_p2  ;;  %s761_s11 = sshll.u32 %s198_s29, 3 }
  0x2f   : > { %s1207_s14 = scalar_lea.hbm %s1381_s0, %s799_s10  ;;  %s202_s28 = scalar_lea.vmem [#allocation2], %s761_s11 }
  0x30   : > { %s209_s6 = sshll.u32 %s202_s28, 4  ;;  %p1209_p11 = pnand %p877_p6, %p38_p8  ;;  %s1213_s6 = int_to_ptr.vmem [resolvable:$true] %s209_s6 }
  0x31   : > { %s1215_s15 = scalar_lea.sflag [#allocation3], %s198_s29  ;;  %s960_s23 = scalar_lea.hbm %s1207_s14, 128 }
  0x32   : > { %p961_p13 = scmp.ne.s32.totalorder %s1207_s14, %s960_s23  ;;  %p962_p0 = pneg %p1209_p11 }
  0x33   : > { %s965_s11 = scalar_lea.hbm %s1381_s0, 256  ;;  %p966_p7 = scmp.lt.u32.totalorder %s1207_s14, %s1381_s0 }
  0x34   : > { %p963_p3 = pnand %p962_p0, %p961_p13  ;;  %p967_p9 = scmp.lt.u32.totalorder %s965_s11, %s960_s23 }
  0x35   : > { %p969_p2 = scmp.lt.u32.totalorder %s960_s23, %s1207_s14 }
  0x36   : > { %p964_p5 = pneg %p963_p3  ;;  %p968_p1 = por %p967_p9, %p966_p7 }
  0x38   : > { %p970_p4 = por %p969_p2, %p968_p1 }
  0x3a   : > { %p971_p6 = pnand %p970_p4, %p964_p5 }
  0x3c   : > { %974 = shalt.err (!%p971_p6)
}
  0x3d   : > { %s975_s29 = scalar_lea.vmem %s1213_s6, 128  ;;  %s1065_s28 = smov [#allocation2]  }
  0x3e   : > { %p976_p8 = scmp.ne.s32.totalorder %s1213_s6, %s975_s29  ;;  %s980_s27 = sshll.u32 %s1065_s28, 4  ;;  %s981_s27 = int_to_ptr.vmem [resolvable:$false] %s980_s27 }
  0x3f   : > { %s982_s10 = scalar_lea.vmem %s981_s27, 256  ;;  %p983_p3 = scmp.lt.s32.totalorder %s1213_s6, %s981_s27 }
  0x40   : > { %p978_p10 = pnand %p976_p8, %p962_p0  ;;  %p984_p7 = scmp.lt.s32.totalorder %s982_s10, %s975_s29 }
  0x42   : > { %p979_p13 = pneg %p978_p10  ;;  %p985_p9 = por %p984_p7, %p983_p3 }
  0x44   : > { %p986_p1 = pnand %p985_p9, %p979_p13 }
  0x46   : > { %989 = shalt.err (!%p986_p1)
}
  0x47   : > { %871 = dma.hbm_to_vmem [thread:$0]  (!%p1209_p11), %s1207_s14, 128, %s1213_s6, %s1215_s15, %s1063_s16, %s1063_s16, %s1064_s17  }
  0x48   : > { %p1397_p0 = scmp.ne.s32.totalorder %s1392_s26, 0 }
  0x49   : > { %s1249_s23 = sand.u32 (!%p1397_p0), 1, %s1052_s19   ;;  %p1398_p5 = scmp.ne.s32.totalorder (!%p1397_p0), %s1390_s24, 0 }
  0x4a   : > { %221 = sbr.rel (%p1397_p0) target bundleno = 803 (0x323), region = 40  ;;  %s765_s11 = sshll.u32 (!%p1397_p0), %s1249_s23, 3 }
  0x4b   : > { %s224_s12 = scalar_lea.sflag (!%p1397_p0), [#allocation3], %s1249_s23  ;;  %s227_s7 = scalar_lea.vmem (!%p1397_p0), [#allocation2], %s765_s11 }
  0x51   : > { %1035 = dma.done.wait (%p1398_p5), %s224_s12, 128  }
  0x52   : > { %1037 = vsyncadd (%p1398_p5), %s224_s12, 4294967168  ;;  %p1399_p11 = scmp.eq.s32.totalorder %s1125_s22, 0 }
  0x54   : > { %1039 = dma.done.wait (%p1399_p11), [#allocation6], 384   ;;  %p1400_p2 = pmov %p1399_p11 }
  0x55   : > { %v1066_v0 = vmov 0.0   ;;  %vm1067_vm0 = vmmov 0   ;;  %v1269_v1 = vld [vmem:[%s227_s7] sm:$0xff]   ;;  %v1068_v3 = vmov 0   ;;  %s1069_s16 = smov 1   ;;  %vm307_vm1 = vcmask 130048  }
  0x56   : > { %1041 = vsyncadd (%p1400_p2), [#allocation6], 4294966912  ;;  %820 = vmatprep.subr.bf16.mxu0 %v1066_v0  ;;  %826 = vmatprep.subr.bf16.mxu1 %v1066_v0  ;;  %v926_v2 = vld [vmem:[%s1382_s1 + $0x8] sm:$0xff]   ;;  %v275_v4 = vld [vmem:[%s1383_s2] sm:$0xff]  ;;  %s1070_s13 = smov 127   ;;  %vm291_vm2 = vcmask 7168   ;;  %v279_v23 = vlaneseq  ;;  %v644_v62 = vunpack.c.l.bf16 %v1269_v1 }
  0x57   : > { %822 = vmatprep.mubr.msk.bf16.mxu0 %vm1067_vm0, %v1066_v0  ;;  %828 = vmatprep.mubr.msk.bf16.mxu1 %vm1067_vm0, %v1066_v0  ;;  %v276_v5 = vld [vmem:[%s1383_s2 + $0x8] sm:$0xff]  ;;  %vm1289_vm3 = vmneg %vm291_vm2  ;;  %v925_v8 = vld [vmem:[%s1382_s1] sm:$0xff]   ;;  %vm298_vm4 = vcmask 1039360   ;;  %s257_s17 = scalar_lea.vmem [#allocation7], %s765_s11  ;;  %s661_s29 = scalar_lea.sflag [#allocation4], %s1249_s23 }
  0x58   : > { %922 = vset.pattern.permute.xlu1 %v1068_v3  ;;  %923 = vset.pattern.permute.xlu0 %v1068_v3  ;;  %v927_v11 = vld [vmem:[%s1382_s1 + $0x10] sm:$0xff]   ;;  %v280_v28 = vand.u32 127, %v279_v23  ;;  %v929_v40 = vld [vmem:[#allocation5 + $0x8] sm:$0xff]   ;;  %v278_v41 = vld [vmem:[%s1385_s4 + $0x8] sm:$0xff]  ;;  %s674_s14 = sshll.u32 %s257_s17, 4  ;;  %s1337_s14 = int_to_ptr.vmem [resolvable:$true] %s674_s14 }
  0x59   : > { %289 = vrot.lane.b32.xlu0 %v1269_v1, %s1069_s16  ;;  %827 = vmatpush3.bf16.msra.mxu1 %v1269_v1  ;;  %v277_v42 = vld [vmem:[%s1385_s4] sm:$0xff]  ;;  %v928_v44 = vld [vmem:[#allocation5] sm:$0xff]   ;;  %s990_s28 = scalar_lea.vmem %s1337_s14, 128 }
  0x5a   : > { %455 = vperm.xlu1 %922, %v275_v4   ;;  %838 = vmatprep.subr.bf16.mxu1 %v1066_v0  ;;  %vm281_vm5 = vcmp.lt.s32.totalorder %v280_v28, 16  ;;  %v930_v47 = vld [vmem:[#allocation5 + $0x10] sm:$0xff]   ;;  %p991_p4 = scmp.ne.s32.totalorder %s1337_s14, %s990_s28 }
  0x5b   : > { %vm786_vm6 = vmpackc.low %vm281_vm5, %vm281_vm5 }
  0x5c   : > { %829 = vmatmul.mubr.msk.bf16.vlgmr.msra.gmra.mrb[0].mxu1 %vm307_vm1, %v926_v2  ;;  %p992_p6 = pnand %p991_p4, %p1198_p12 }
  0x5d   : > { %296 = vrot.lane.b32.xlu0 %v1269_v1, %s1070_s13  ;;  %840 = vmatprep.mubr.msk.bf16.mxu1 %vm1067_vm0, %v1066_v0 }
  0x5e   : > { %460 = vperm.xlu1 %922, %v276_v5   ;;  %p993_p8 = pneg %p992_p6 }
  0xcb   : > { %v290_v7 = vpop.permute.xlu0 %289 }
  0xcc   : > { %821 = vmatpush3.bf16.msk.msra.mxu0 %vm1289_vm3, %v290_v7 }
  0xcd   : > { %832 = vmatprep.subr.bf16.mxu0 %v1066_v0 }
  0xcf   : > { %823 = vmatmul.mubr.msk.bf16.vlgmr.msra.gmra.mrb[0].mxu0 %vm307_vm1, %v925_v8  ;;  %v297_v9 = vpop.permute.xlu0 %296 }
  0xd0   : > { %v300_v10 = vsel %vm298_vm4, %v297_v9, 0  ;;  %834 = vmatprep.mubr.msk.bf16.mxu0 %vm1067_vm0, %v1066_v0 }
  0xd1   : > { %833 = vmatpush3.bf16.msra.mxu0 %v300_v10 }
  0xd2   : > { %844 = vmatprep.subr.bf16.mxu0 %v1066_v0 }
  0xd7   : > { %835 = vmatmul.mubr.msk.bf16.vlgmr.msra.gmra.mrb[4].mxu0 %vm307_vm1, %v927_v11 }
  0xd8   : > { %846 = vmatprep.mubr.msk.bf16.mxu0 %vm1067_vm0, %v1066_v0 }
  0xd9   : > { %v456_v22 = vpop.permute.xlu1 %455 }
  0xdd   : > { %v461_v32 = vpop.permute.xlu1 %460 }
 0x12f   : > { %v395_v12 = vpop.f32.mrb[0].mxu1 }
 0x130   : > { %v830_v13 = vpop.f32.mrb[1].mxu1 }
 0x131   : > { %v398_v14 = vpop.f32.mrb[2].mxu1 }
 0x132   : > { %v831_v15 = vpop.f32.mrb[3].mxu1 }
 0x1a2   : > { %v345_v16 = vpop.f32.mrb[0].mxu0 }
 0x1a3   : > { %v396_v17 = vadd.f32 %v395_v12, %v345_v16  ;;  %v824_v18 = vpop.f32.mrb[1].mxu0 }
 0x1a4   : > { %v348_v19 = vpop.f32.mrb[2].mxu0 }
 0x1a5   : > { %v399_v20 = vadd.f32 %v398_v14, %v348_v19  ;;  %v825_v21 = vpop.f32.mrb[3].mxu0 }
 0x1aa   : > { %v444_v24 = vpop.f32.mrb[4].mxu0 }
 0x1ab   : > { %v451_v25 = vadd.f32 %v444_v24, %v396_v17  ;;  %v836_v26 = vpop.f32.mrb[5].mxu0 }
 0x1ac   : > { %v447_v27 = vpop.f32.mrb[6].mxu0 }
 0x1ad   : > { %v463_v29 = vadd.f32 %v456_v22, %v451_v25  ;;  %v452_v30 = vadd.f32 %v447_v27, %v399_v20  ;;  %v837_v31 = vpop.f32.mrb[7].mxu0 }
 0x1af   : > { %v465_v33 = vmax.f32 %v463_v29, 0.0  ;;  %v464_v34 = vadd.f32 %v461_v32, %v452_v30 }
 0x1b1   : > { %v466_v35 = vmax.f32 %v464_v34, 0.0  ;;  %v469_v37 = vsel %vm281_vm5, %v465_v33, 0.0 }
 0x1b3   : > { %v787_v36 = vpack.c.bf16 %v466_v35, %v465_v33  ;;  %v470_v38 = vsel %vm281_vm5, %v466_v35, 0.0 }
 0x1b4   : > { %v471_v39 = vpack.c.bf16 %v470_v38, %v469_v37 }
 0x1b5   : > { %845 = vmatpush3.bf16.msk.msra.mxu0 %vm786_vm6, %v787_v36 }
 0x1b6   : > { %478 = vrot.lane.b32.xlu1 %v471_v39, %s1070_s13  ;;  %473 = vrot.lane.b32.xlu0 %v471_v39, %s1069_s16  ;;  %s802_s16 = sshll.u32 %s1125_s22, 7  ;;  %s1071_s22 = smov [#allocation7]  }
 0x1b7   : > { %s1335_s13 = scalar_lea.hbm %s1386_s5, %s802_s16  ;;  %s994_s11 = sshll.u32 %s1071_s22, 4  ;;  %s995_s11 = int_to_ptr.vmem [resolvable:$false] %s994_s11 }
 0x1b8   : > { %847 = vmatmul.mubr.msk.bf16.vlgmr.msra.gmra.mrb[8].mxu0 %vm307_vm1, %v929_v40  ;;  %s996_s27 = scalar_lea.vmem %s995_s11, 256  ;;  %p997_p10 = scmp.lt.s32.totalorder %s1337_s14, %s995_s11 }
 0x1b9   : > { %p998_p13 = scmp.lt.s32.totalorder %s996_s27, %s990_s28 }
 0x1ba   : > { %639 = vperm.xlu1 %922, %v278_v41   ;;  %634 = vperm.xlu0 %923, %v277_v42  }
 0x1bb   : > { %p999_p3 = por %p998_p13, %p997_p10 }
 0x1bd   : > { %p1000_p7 = pnand %p999_p3, %p993_p8 }
 0x228   : > { %v474_v43 = vpop.permute.xlu0 %473  ;;  %v479_v45 = vpop.permute.xlu1 %478 }
 0x229   : > { %839 = vmatpush3.bf16.msk.msra.mxu1 %vm1289_vm3, %v474_v43  ;;  %v481_v46 = vsel %vm298_vm4, %v479_v45, 0 }
 0x22a   : > { %850 = vmatprep.subr.bf16.mxu1 %v1066_v0 }
 0x22c   : > { %841 = vmatmul.mubr.msk.bf16.vlgmr.msra.gmra.mrb[4].mxu1 %vm307_vm1, %v928_v44 }
 0x22d   : > { %851 = vmatpush3.bf16.msra.mxu1 %v481_v46  ;;  %852 = vmatprep.mubr.msk.bf16.mxu1 %vm1067_vm0, %v1066_v0  ;;  %v645_v0 = vunpack.c.h.bf16 %v1269_v1 }
 0x234   : > { %853 = vmatmul.mubr.msk.bf16.vlgmr.msra.gmra.mrb[8].mxu1 %vm307_vm1, %v930_v47 }
 0x239   : > { %v635_v59 = vpop.permute.xlu0 %634  ;;  %v640_v5 = vpop.permute.xlu1 %639 }
 0x28b   : > { %v574_v48 = vpop.f32.mrb[8].mxu0 }
 0x28c   : > { %v848_v49 = vpop.f32.mrb[9].mxu0 }
 0x28d   : > { %v577_v50 = vpop.f32.mrb[10].mxu0 }
 0x28e   : > { %v849_v51 = vpop.f32.mrb[11].mxu0 }
 0x2ff   : > { %v525_v52 = vpop.f32.mrb[4].mxu1 }
 0x300   : > { %v842_v53 = vpop.f32.mrb[5].mxu1  ;;  %v575_v54 = vadd.f32 %v574_v48, %v525_v52 }
 0x301   : > { %v528_v55 = vpop.f32.mrb[6].mxu1 }
 0x302   : > { %v843_v56 = vpop.f32.mrb[7].mxu1  ;;  %v578_v57 = vadd.f32 %v577_v50, %v528_v55 }
 0x307   : > { %v623_v58 = vpop.f32.mrb[8].mxu1 }
 0x308   : > { %v630_v60 = vadd.f32 %v623_v58, %v575_v54  ;;  %v854_v61 = vpop.f32.mrb[9].mxu1 }
 0x309   : > { %v626_v63 = vpop.f32.mrb[10].mxu1 }
 0x30a   : > { %v631_v2 = vadd.f32 %v626_v63, %v578_v57  ;;  %v642_v3 = vadd.f32 %v635_v59, %v630_v60  ;;  %v855_v4 = vpop.f32.mrb[11].mxu1 }
 0x30c   : > { %v643_v6 = vadd.f32 %v640_v5, %v631_v2  ;;  %v646_v7 = vadd.f32 %v644_v62, %v642_v3 }
 0x30e   : > { %v647_v8 = vadd.f32 %v645_v0, %v643_v6  ;;  %v648_v10 = vmax.f32 %v646_v7, 0.0 }
 0x310   : > { %v649_v9 = vmax.f32 %v647_v8, 0.0 }
 0x312   : > { %v806_v1 = vpack.c.bf16 %v649_v9, %v648_v10 }
 0x314   : > { %807 = vst [vmem:[%s257_s17] sm:$0xff] %v806_v1  }
 0x315   : > { %1003 = shalt.err (!%p1000_p7)
}
 0x316   : > { %s1004_s10 = scalar_lea.hbm %s1335_s13, 128  ;;  %s1008_s24 = scalar_lea.hbm %s1386_s5, 256 }
 0x317   : > { %p1005_p9 = scmp.ne.s32.totalorder %s1335_s13, %s1004_s10  ;;  %p1009_p5 = scmp.lt.u32.totalorder %s1335_s13, %s1386_s5 }
 0x318   : > { %p1010_p11 = scmp.lt.u32.totalorder %s1008_s24, %s1004_s10  ;;  %p1012_p4 = scmp.lt.u32.totalorder %s1004_s10, %s1335_s13 }
 0x319   : > { %p1006_p1 = pnand %p1005_p9, %p1198_p12 }
 0x31a   : > { %p1011_p2 = por %p1010_p11, %p1009_p5 }
 0x31b   : > { %p1007_p0 = pneg %p1006_p1 }
 0x31c   : > { %p1013_p6 = por %p1012_p4, %p1011_p2 }
 0x31e   : > { %p1014_p8 = pnand %p1013_p6, %p1007_p0 }
 0x320   : > { %1017 = shalt.err (!%p1014_p8)
}
 0x321   : > { %s1072_s17 = smov 64   ;;  %s1073_s6 = smov 4  }
 0x322   : > { %862 = dma.vmem_to_hbm [thread:$0]  (%p1198_p12), %s1337_s14, 128, %s1335_s13, %s661_s29, %s1072_s17, %s1072_s17, %s1073_s6  }
 0x323 PF: > { %s689_s15 = sand.u32 1, %s1048_s18   ;;  %p1403_p10 = scmp.ne.s32.totalorder %s1391_s25, 0 }
 0x324   : > { %p1404_p13 = scmp.ge.s32.totalorder %s1060_s21, 2  ;;  %s690_s28 = scalar_lea.sflag [#allocation4], %s689_s15 }
 0x326   : > { %p873_p3 = pnand %p1404_p13, %p1403_p10 }
 0x328   : > { %1043 = dma.done.wait (!%p873_p3), %s690_s28, 128  }
 0x329   : > { %1045 = vsyncadd (!%p873_p3), %s690_s28, 4294967168  ;;  %p19_p7 = scmp.ge.s32.totalorder %s1160_s30, 4   ;;  %s1405_s18 = smov %s1052_s19 }
 0x32a   : > { %s1406_s19 = smov %s1056_s20  ;;  %s1407_s20 = smov %s1194_s8 }
 0x32b   : > { %s1408_s21 = smov %s1160_s30  ;;  %21 = sbr.rel (!%p19_p7) target bundleno = 6 (0x6), region = 93 }
 0x332   :  { %695 = vsyncpa [#allocation3], 1 }
 0x333   :  { %697 = vsyncpa [#allocation3 + $0x1], 1 }
 0x334   :  { %698 = vsyncpa [#allocation6], 1 }
 0x335   :  { %699 = vsyncpa [#allocation4], 1 }
 0x336   :  { %701 = vsyncpa [#allocation4 + $0x1], 1 }

</bundles_post_ra>
